<compile_context>
chip_gen: v5e
topology: v5e:2x2
jax: 0.10.0
libtpu: 0.0.40
codegen_flags: <defaults>
</compile_context>

<pallas_src>
import functools

import jax
import jax.numpy as jnp
from jax import lax
from jax.experimental import pallas as pl
from jax.experimental.pallas import tpu as pltpu


def _sf_partial_kernel(x_ref, sum_r_ref, sum_c_ref, *, H, W, tb, n_valid,
                       mask_rows):
    """One grid step: partial row/col squared-diff sums for a (tb, H*W) block."""
    L = H * W
    x = x_ref[...].astype(jnp.float32)                    # (tb, H*W), lane-dense

    # Row frequency: x[p] - x[p + W]  (same image, next image row). No seams.
    rd = x[:, : (H - 1) * W] - x[:, W:]
    rsq = rd * rd

    # Column frequency: x[p] - x[p + 1], mask positions that wrap across an
    # image-row boundary (p % W == W-1).
    cd = x[:, : L - 1] - x[:, 1:]
    lane = lax.broadcasted_iota(jnp.int32, (1, L - 1), 1)
    not_seam = (lane % W) != (W - 1)
    csq = jnp.where(not_seam, cd * cd, 0.0)

    if mask_rows:
        # Last block may read past B*C rows: drop the padded rows (use a
        # select, not a multiply, so OOB garbage/NaN cannot leak through).
        i = pl.program_id(0)
        row = i * tb + lax.broadcasted_iota(jnp.int32, (tb, 1), 0)
        valid = row < n_valid
        rsq = jnp.where(valid, rsq, 0.0)
        csq = jnp.where(valid, csq, 0.0)

    # Lane-dense (1, 8, 128) output tiles; wrapper reads element [0, 0].
    sum_r_ref[...] = jnp.zeros(sum_r_ref.shape, jnp.float32) + jnp.sum(rsq)
    sum_c_ref[...] = jnp.zeros(sum_c_ref.shape, jnp.float32) + jnp.sum(csq)


def spatial_frequency_loss(img):
    """img: (B, C, H, W) float array -> scalar spatial frequency (f32)."""
    B, C, H, W = img.shape
    N = B * C
    L = H * W
    x = img.reshape(N, L)                                  # free contiguous view

    # ---- generation-aware tiling --------------------------------------------
    try:
        vmem_cap = int(pltpu.get_tpu_info().vmem_capacity_bytes)
    except Exception:
        vmem_cap = 64 * 1024 * 1024                        # conservative (v7x)
    if vmem_cap <= 0:
        vmem_cap = 64 * 1024 * 1024

    # Per-block f32 working-set budget; leaves room for double-buffered input
    # DMAs plus the shifted/squared elementwise temporaries (~6x one block).
    block_budget = vmem_cap // 16
    tb = max(1, block_budget // (L * 4))
    if tb >= N:
        tb = N                                             # full dim: any size ok
    else:
        tb = max(8, (tb // 8) * 8)                         # sublane-aligned blocks
        tb = min(tb, N)
    num_blocks = pl.cdiv(N, tb)
    mask_rows = (N % tb) != 0

    vmem_limit = min(vmem_cap, max(32 * 1024 * 1024, vmem_cap // 2))

    kernel = functools.partial(_sf_partial_kernel, H=H, W=W, tb=tb,
                               n_valid=N, mask_rows=mask_rows)

    itemsize = jnp.dtype(img.dtype).itemsize
    cost = pl.CostEstimate(
        flops=6 * N * L,
        transcendentals=0,
        bytes_accessed=N * L * itemsize + num_blocks * 2 * 8 * 128 * 4,
    )

    part_shape = jax.ShapeDtypeStruct((num_blocks, 8, 128), jnp.float32)
    sum_r_p, sum_c_p = pl.pallas_call(
        kernel,
        out_shape=(part_shape, part_shape),
        grid_spec=pltpu.PrefetchScalarGridSpec(
            num_scalar_prefetch=0,
            grid=(num_blocks,),
            in_specs=[pl.BlockSpec((tb, L), lambda i: (i, 0))],
            out_specs=(pl.BlockSpec((1, 8, 128), lambda i: (i, 0, 0)),
                       pl.BlockSpec((1, 8, 128), lambda i: (i, 0, 0))),
        ),
        compiler_params=pltpu.CompilerParams(
            dimension_semantics=("parallel",),             # no carried state
            vmem_limit_bytes=vmem_limit,
        ),
        cost_estimate=cost,
    )(x)

    sum_r = jnp.sum(sum_r_p[:, 0, 0])
    sum_c = jnp.sum(sum_c_p[:, 0, 0])
    n_row = N * (H - 1) * W                                # count of row diffs
    n_col = N * H * (W - 1)                                # count of col diffs
    return jnp.sqrt(sum_r / n_row + sum_c / n_col)


def _reference(img):
    img = img.astype(jnp.float32)
    row_diff = img[:, :, :-1, :] - img[:, :, 1:, :]
    col_diff = img[:, :, :, :-1] - img[:, :, :, 1:]
    rf = jnp.sqrt(jnp.mean(row_diff ** 2))
    cf = jnp.sqrt(jnp.mean(col_diff ** 2))
    return jnp.sqrt(rf ** 2 + cf ** 2)


if __name__ == "__main__":
    key = jax.random.PRNGKey(0)

    # Primary check: small NCHW image batch.
    B, C, H, W = 2, 4, 16, 16
    img = jax.random.normal(key, (B, C, H, W), dtype=jnp.float32)
    sf = jax.block_until_ready(spatial_frequency_loss(img))
    ref = jax.block_until_ready(_reference(img))
    assert jnp.allclose(sf, ref, rtol=1e-5, atol=1e-5), (sf, ref)

    # Secondary check: odd (non power-of-two) spatial dims exercise the seam
    # masking / unaligned lane widths.
    key2 = jax.random.PRNGKey(0)
    img2 = jax.random.normal(key2, (2, 3, 17, 23), dtype=jnp.float32)
    sf2 = jax.block_until_ready(spatial_frequency_loss(img2))
    ref2 = jax.block_until_ready(_reference(img2))
    assert jnp.allclose(sf2, ref2, rtol=1e-5, atol=1e-5), (sf2, ref2)

    print("KERNEL_OK")
</pallas_src>

<mosaic_0001>
module attributes {stable_mosaic.version = 11 : i64} {
  func.func @_sf_partial_kernel(%arg0: i32, %arg1: memref<8x256xf32, #tpu.memory_space<vmem>>, %arg2: memref<1x8x128xf32, #tpu.memory_space<vmem>>, %arg3: memref<1x8x128xf32, #tpu.memory_space<vmem>>) attributes {dimension_semantics = [#tpu.dimension_semantics<parallel>], iteration_bounds = array<i64: 1>, scalar_prefetch = 0 : i64, scratch_operands = 0 : i64, tpu.core_type = #tpu.core_type<tc>, window_params = [{transform_indices = @transform_0, window_bounds = array<i64: 8, 256>}, {transform_indices = @transform_1, window_bounds = array<i64: 1, 8, 128>}, {transform_indices = @transform_2, window_bounds = array<i64: 1, 8, 128>}]} {
    %c0 = arith.constant 0 : index
    %c0_0 = arith.constant 0 : index
    %0 = vector.load %arg1[%c0, %c0_0] : memref<8x256xf32, #tpu.memory_space<vmem>>, vector<8x256xf32>
    %1 = vector.extract_strided_slice %0 {offsets = [0, 0], sizes = [8, 240], strides = [1, 1]} : vector<8x256xf32> to vector<8x240xf32>
    %2 = vector.extract_strided_slice %0 {offsets = [0, 16], sizes = [8, 240], strides = [1, 1]} : vector<8x256xf32> to vector<8x240xf32>
    %3 = arith.subf %1, %2 : vector<8x240xf32>
    %4 = arith.mulf %3, %3 : vector<8x240xf32>
    %5 = vector.extract_strided_slice %0 {offsets = [0, 0], sizes = [8, 255], strides = [1, 1]} : vector<8x256xf32> to vector<8x255xf32>
    %6 = vector.extract_strided_slice %0 {offsets = [0, 1], sizes = [8, 255], strides = [1, 1]} : vector<8x256xf32> to vector<8x255xf32>
    %7 = arith.subf %5, %6 : vector<8x255xf32>
    %8 = tpu.iota {dimensions = array<i32: 1>} : vector<1x255xi32>
    %c16_i32 = arith.constant 16 : i32
    %c0_i32 = arith.constant 0 : i32
    %9 = arith.cmpi eq, %c16_i32, %c0_i32 : i32
    %c1_i32 = arith.constant 1 : i32
    %10 = arith.select %9, %c1_i32, %c16_i32 : i32
    %11 = vector.broadcast %10 : i32 to vector<1x255xi32>
    %12 = arith.remsi %8, %11 : vector<1x255xi32>
    %c0_i32_1 = arith.constant 0 : i32
    %13 = vector.broadcast %c0_i32_1 : i32 to vector<1x255xi32>
    %14 = arith.cmpi ne, %12, %13 : vector<1x255xi32>
    %c0_i32_2 = arith.constant 0 : i32
    %15 = vector.broadcast %c0_i32_2 : i32 to vector<1x255xi32>
    %16 = arith.cmpi slt, %12, %15 : vector<1x255xi32>
    %c0_i32_3 = arith.constant 0 : i32
    %17 = arith.cmpi slt, %10, %c0_i32_3 : i32
    %18 = vector.broadcast %17 : i1 to vector<1x255xi1>
    %19 = vector.broadcast %18 : vector<1x255xi1> to vector<1x255xi1>
    %20 = arith.xori %16, %19 : vector<1x255xi1>
    %21 = arith.andi %20, %14 : vector<1x255xi1>
    %22 = vector.broadcast %10 : i32 to vector<1x255xi32>
    %23 = arith.addi %12, %22 : vector<1x255xi32>
    %24 = arith.select %21, %23, %12 : vector<1x255xi1>, vector<1x255xi32>
    %c15_i32 = arith.constant 15 : i32
    %25 = vector.broadcast %c15_i32 : i32 to vector<1x255xi32>
    %26 = arith.cmpi ne, %24, %25 : vector<1x255xi32>
    %27 = arith.mulf %7, %7 : vector<8x255xf32>
    %cst = arith.constant 0.000000e+00 : f32
    %28 = vector.shape_cast %26 : vector<1x255xi1> to vector<1x255xi1>
    %29 = vector.broadcast %28 : vector<1x255xi1> to vector<8x255xi1>
    %30 = vector.broadcast %cst : f32 to vector<8x255xf32>
    %31 = arith.select %29, %27, %30 : vector<8x255xi1>, vector<8x255xf32>
    %cst_4 = arith.constant 0.000000e+00 : f32
    %32 = vector.broadcast %cst_4 : f32 to vector<1x8x128xf32>
    %33 = vector.shape_cast %4 : vector<8x240xf32> to vector<1x8x240xf32>
    %cst_5 = arith.constant dense<0.000000e+00> : vector<1xf32>
    %34 = vector.multi_reduction <add>, %33, %cst_5 [1, 2] : vector<1x8x240xf32> to vector<1xf32>
    %35 = vector.shape_cast %34 : vector<1xf32> to vector<1x1x1xf32>
    %36 = vector.extract %35[0, 0, 0] : f32 from vector<1x1x1xf32>
    %37 = vector.broadcast %36 : f32 to vector<1x8x128xf32>
    %38 = arith.addf %32, %37 : vector<1x8x128xf32>
    %c0_6 = arith.constant 0 : index
    %c0_7 = arith.constant 0 : index
    %c0_8 = arith.constant 0 : index
    %39 = vector.load %arg2[%c0_6, %c0_7, %c0_8] : memref<1x8x128xf32, #tpu.memory_space<vmem>>, vector<1x8x128xf32>
    tpu.vector_store %arg2[%c0_6, %c0_7, %c0_8], %38 {strides = array<i32>} : memref<1x8x128xf32, #tpu.memory_space<vmem>>, vector<1x8x128xf32>,
    %cst_9 = arith.constant 0.000000e+00 : f32
    %40 = vector.broadcast %cst_9 : f32 to vector<1x8x128xf32>
    %41 = vector.shape_cast %31 : vector<8x255xf32> to vector<1x8x255xf32>
    %cst_10 = arith.constant dense<0.000000e+00> : vector<1xf32>
    %42 = vector.multi_reduction <add>, %41, %cst_10 [1, 2] : vector<1x8x255xf32> to vector<1xf32>
    %43 = vector.shape_cast %42 : vector<1xf32> to vector<1x1x1xf32>
    %44 = vector.extract %43[0, 0, 0] : f32 from vector<1x1x1xf32>
    %45 = vector.broadcast %44 : f32 to vector<1x8x128xf32>
    %46 = arith.addf %40, %45 : vector<1x8x128xf32>
    %c0_11 = arith.constant 0 : index
    %c0_12 = arith.constant 0 : index
    %c0_13 = arith.constant 0 : index
    %47 = vector.load %arg3[%c0_11, %c0_12, %c0_13] : memref<1x8x128xf32, #tpu.memory_space<vmem>>, vector<1x8x128xf32>
    tpu.vector_store %arg3[%c0_11, %c0_12, %c0_13], %46 {strides = array<i32>} : memref<1x8x128xf32, #tpu.memory_space<vmem>>, vector<1x8x128xf32>,
    return
  }
  func.func @transform_0(%arg0: i32) -> (i32, i32) {
    %c0_i32 = arith.constant 0 : i32
    %c0_i32_0 = arith.constant 0 : i32
    return %arg0, %c0_i32 : i32, i32
  }
  func.func @transform_1(%arg0: i32) -> (i32, i32, i32) {
    %c0_i32 = arith.constant 0 : i32
    %c0_i32_0 = arith.constant 0 : i32
    %c0_i32_1 = arith.constant 0 : i32
    return %arg0, %c0_i32, %c0_i32_0 : i32, i32, i32
  }
  func.func @transform_2(%arg0: i32) -> (i32, i32, i32) {
    %c0_i32 = arith.constant 0 : i32
    %c0_i32_0 = arith.constant 0 : i32
    %c0_i32_1 = arith.constant 0 : i32
    return %arg0, %c0_i32, %c0_i32_0 : i32, i32, i32
  }
}

</mosaic_0001>

<bundles_post_ra>
// kernel: tpu_custom_call.1
= control target key start
LH: loop header
LB: loop body
LE: loop exit
PB: predicated region body
PF: predicated region fallthrough
CT: control target
= control target key end

     0   :  { %8 = vsyncpa [#allocation3], 0  ;;  %s270_s0 = inlined_call_operand.hbm [shape: f32[8,256], index: 0, kind: input, shape index: {}]   ;;  %s271_s1 = inlined_call_operand.hbm [shape: f32[1,8,128], index: 1, kind: output, shape index: {0}]   ;;  %s272_s2 = inlined_call_operand.hbm [shape: f32[1,8,128], index: 2, kind: output, shape index: {1}]  }
   0x1   :  { %9 = vsyncpa [#allocation4], 0 }
   0x2   :  { %10 = vsyncpa [#allocation7], 0  ;;  %s16_s11 = sshll.u32 %s270_s0, 4  ;;  %s237_s12 = smov [#allocation2]   ;;  %s17_s11 = int_to_ptr.hbm [resolvable:$true] %s16_s11 }
   0x3   :  { %s18_s13 = sshll.u32 %s237_s12, 4  ;;  %s19_s13 = int_to_ptr.vmem [resolvable:$true] %s18_s13 }
   0x4   :  { %21 = dma.hbm_to_vmem [thread:$0]  %s17_s11, 256, %s19_s13, [#allocation3]  }
   0x5   :  { %231 = dma.done.wait [#allocation3], 256  }
   0x6   :  { %232 = vsyncadd [#allocation3], 4294967040  ;;  %v26_v0 = vld [vmem:[#allocation2] sm:$0xff]  ;;  %s238_s14 = smov 112   ;;  %s239_s15 = smov 127   ;;  %v27_v1 = vld [vmem:[#allocation2 + $0x8] sm:$0xff]  ;;  %v52_v2 = vlaneseq }
   0x7   :  { %30 = vrot.lane.b32.xlu1 %v26_v0, %s238_s14  ;;  %42 = vrot.lane.b32.xlu0 %v26_v0, %s239_s15  ;;  %vm34_vm0 = vcmask 916480   ;;  %vm46_vm1 = vcmask 1039360   ;;  %s240_s0 = smov [#allocation5]   ;;  %s124_s19 = sshll.u32 %s271_s1, 4  ;;  %s125_s19 = int_to_ptr.hbm [resolvable:$true] %s124_s19 }
   0x8   :  { %v53_v5 = vand.u32 127, %v52_v2  ;;  %s122_s16 = sshll.u32 %s240_s0, 4  ;;  %s241_s21 = smov [#allocation6]   ;;  %s123_s16 = int_to_ptr.vmem [resolvable:$true] %s122_s16 }
   0x9   :  { %s133_s22 = sshll.u32 %s241_s21, 4  ;;  %s135_s25 = sshll.u32 %s272_s2, 4  ;;  %s134_s22 = int_to_ptr.vmem [resolvable:$true] %s133_s22  ;;  %s136_s25 = int_to_ptr.hbm [resolvable:$true] %s135_s25 }
   0xa   :  { %v54_v6 = vadd.s32 128, %v53_v5  ;;  %v59_v19 = vand.u32 15, %v53_v5 }
   0xc   :  { %v66_v8 = vand.u32 15, %v54_v6  ;;  %vm79_vm3 = vcmp.ne.s32.totalorder %v59_v19, 15 }
   0xe   :  { %vm80_vm2 = vcmp.ne.s32.totalorder %v66_v8, 15 }
   0xf   :  { %32 = vrot.lane.b32.xlu1 %v27_v1, %s238_s14  ;;  %44 = vrot.lane.b32.xlu0 %v27_v1, %s239_s15 }
  0x79   :  { %v31_v3 = vpop.permute.xlu1 %30  ;;  %v43_v4 = vpop.permute.xlu0 %42 }
  0x81   :  { %v33_v7 = vpop.permute.xlu1 %32  ;;  %v45_v9 = vpop.permute.xlu0 %44 }
  0x82   :  { %v35_v10 = vsel %vm34_vm0, %v31_v3, %v33_v7  ;;  %v39_v11 = vsub.f32 %v27_v1, %v33_v7  ;;  %v47_v12 = vsel %vm46_vm1, %v43_v4, %v45_v9  ;;  %v51_v13 = vsub.f32 %v27_v1, %v45_v9 }
  0x83   :  { %v38_v14 = vsub.f32 %v26_v0, %v35_v10  ;;  %v50_v16 = vsub.f32 %v26_v0, %v47_v12 }
  0x84   :  { %v41_v15 = vmul.f32 %v39_v11, %v39_v11  ;;  %v82_v17 = vmul.f32 %v51_v13, %v51_v13 }
  0x85   :  { %v40_v18 = vmul.f32 %v38_v14, %v38_v14  ;;  %v81_v22 = vmul.f32 %v50_v16, %v50_v16 }
  0x86   :  { %v89_v20 = vsel %vm34_vm0, %v41_v15, 0.0  ;;  %v88_v23 = vsel %vm80_vm2, %v82_v17, 0.0 }
  0x87   :  { %v90_v21 = vadd.f32 %v89_v20, %v40_v18  ;;  %v87_v24 = vsel %vm79_vm3, %v81_v22, 0.0  ;;  %v103_v25 = vsel %vm46_vm1, %v88_v23, 0.0 }
  0x88   :  { %v104_v26 = vadd.f32 %v103_v25, %v87_v24 }
  0x89   :  { %91 = vadd.xlane.f32.xlu2 %v90_v21 }
  0x91   :  { %105 = vadd.xlane.f32.xlu2 %v104_v26 }
  0xfc   :  { %v92_v27 = vpop.xlane.xlu2 %91 }
  0xfd   :  { %v93_v28 = vrot.slane %v92_v27, 4 }
  0xff   :  { %v94_v29 = vadd.f32 %v93_v28, %v92_v27 }
 0x101   :  { %v95_v30 = vrot.slane %v94_v29, 2 }
 0x103   :  { %v96_v31 = vadd.f32 %v95_v30, %v94_v29 }
 0x104   :  { %v106_v32 = vpop.xlane.xlu2 %105 }
 0x105   :  { %v107_v33 = vrot.slane %v106_v32, 4  ;;  %v97_v34 = vrot.slane %v96_v31, 1 }
 0x107   :  { %v108_v35 = vadd.f32 %v107_v33, %v106_v32  ;;  %v98_v36 = vadd.f32 %v97_v34, %v96_v31 }
 0x109   :  { %v109_v37 = vrot.slane %v108_v35, 2  ;;  %150 = vpush %v98_v36 }
 0x10b   :  { %v110_v38 = vadd.f32 %v109_v37, %v108_v35 }
 0x10d   :  { %v111_v39 = vrot.slane %v110_v38, 1 }
 0x10f   :  { %v112_v40 = vadd.f32 %v111_v39, %v110_v38 }
 0x111   :  { %152 = vpush %v112_v40 }
 0x13a   :  { %s151_s20 = spop %150 }
 0x13b   :  { %v100_v41 = vstv %s151_s20 }
 0x13c   :  { %102 = vst [vmem:[#allocation5] sm:$0xff] %v100_v41 }
 0x13d   :  { %127 = dma.vmem_to_hbm [thread:$0]  %s123_s16, 128, %s125_s19, [#allocation4]  }
 0x142   :  { %s153_s26 = spop %152 }
 0x143   :  { %v114_v42 = vstv %s153_s26 }
 0x144   :  { %116 = vst [vmem:[#allocation6] sm:$0xff] %v114_v42 }
 0x145   :  { %138 = dma.vmem_to_hbm [thread:$0]  %s134_s22, 128, %s136_s25, [#allocation7]  }
 0x146   :  { %233 = dma.done.wait [#allocation4], 128  }
 0x147   :  { %234 = vsyncadd [#allocation4], 4294967168 }
 0x148   :  { %235 = dma.done.wait [#allocation7], 128  }
 0x149   :  { %236 = vsyncadd [#allocation7], 4294967168 }
 0x14a   :  { %147 = vsyncpa [#allocation3], 1 }
 0x14b   :  { %148 = vsyncpa [#allocation4], 1 }
 0x14c   :  { %149 = vsyncpa [#allocation7], 1 }

</bundles_post_ra>
